<compile_context>
chip_gen: v5e
topology: v5e:2x2
jax: 0.10.0
libtpu: 0.0.40
codegen_flags: <defaults>
</compile_context>

<pallas_src>
import functools

import jax
import jax.numpy as jnp
from jax import lax
from jax.experimental import pallas as pl
from jax.experimental.pallas import tpu as pltpu


# ---------------------------------------------------------------------------
# In-kernel helpers
# ---------------------------------------------------------------------------
def _exact_selector_dot(m, sel):
    """m @ sel with f32 accumulation, bit-exact for a 0/1 bf16 selector.

    bf16 operands go straight to the MXU (exact: one nonzero term per output,
    f32 accumulation).  Wider floats are split into three bf16 pieces with
    hi + mid + lo == value exactly (24-bit mantissa covered by 3x8 bits), and
    summed across three native-bf16 MXU passes -> exact permutation regardless
    of the platform's f32 matmul precision mode.
    """
    if m.dtype == jnp.bfloat16:
        return jnp.dot(m, sel, preferred_element_type=jnp.float32)
    a = m.astype(jnp.float32)
    hi = a.astype(jnp.bfloat16)
    r = a - hi.astype(jnp.float32)
    mid = r.astype(jnp.bfloat16)
    lo = (r - mid.astype(jnp.float32)).astype(jnp.bfloat16)
    acc = jnp.dot(hi, sel, preferred_element_type=jnp.float32)
    acc = acc + jnp.dot(mid, sel, preferred_element_type=jnp.float32)
    acc = acc + jnp.dot(lo, sel, preferred_element_type=jnp.float32)
    return acc


def _unshuffle_direct_kernel(csel_ref, x_ref, o_ref, *, ry, rx, cblk, tho):
    """Direct-layout kernel (requires Wo % 128 == 0 => W % 128 == 0).

    csel_ref: (W, rx*Wo) bf16,  csel[w, dx*Wo + j] = (w == j*rx + dx)
    x_ref   : (cblk, tho, ry*W)   lane index dy*W + w  <-> source (i*ry+dy, w)
    o_ref   : (cblk, ry, rx, tho, Wo)  -- final layout, no wrapper transpose
    """
    W = x_ref.shape[-1] // ry
    Wo = W // rx
    csel = csel_ref[...]
    for dy in range(ry):
        # Row phase: tile-aligned lane window (dy*W is a multiple of 128).
        rows = x_ref[:, :, pl.ds(dy * W, W)]                  # (cblk, tho, W)
        acc = _exact_selector_dot(rows.reshape(cblk * tho, W), csel)
        out = acc.reshape(cblk, tho, W).astype(o_ref.dtype)
        # Column phase result is dx-major in lanes: aligned 128-multiple
        # slices, stored as unmasked Wo-wide vst into the final layout.
        for dx in range(rx):
            o_ref[:, dy, dx, :, :] = out[:, :, dx * Wo:(dx + 1) * Wo]


def _unshuffle_fused_kernel(csel_ref, x_ref, o_ref, *, cblk, tho):
    """Fused-lane kernel (Wo < 128): one matmul per block, zero slicing.

    csel_ref: (ry*W, ry*W) bf16,
              CSEL[dy*W + j*rx + dx, dy*rx*Wo + dx*Wo + j] = 1
    x_ref / o_ref: (cblk, tho, ry*W)  -- output stays maximally lane-dense;
    the wrapper performs the single cheap layout pass afterwards.
    """
    ryW = x_ref.shape[-1]
    m = x_ref[...].reshape(cblk * tho, ryW)
    acc = _exact_selector_dot(m, csel_ref[...])
    o_ref[...] = acc.reshape(cblk, tho, ryW).astype(o_ref.dtype)


# ---------------------------------------------------------------------------
# Tiling policy
# ---------------------------------------------------------------------------
def _divisors_desc(n):
    return [d for d in range(n, 0, -1) if n % d == 0]


def _vmem_budget():
    """Generation-aware (per-step VMEM budget, scoped vmem_limit_bytes)."""
    cap = None
    try:
        cap = getattr(pltpu.get_tpu_info(), "vmem_capacity_bytes", None)
    except Exception:
        cap = None
    if cap is not None and cap >= 100 * (1 << 20):   # v5e / v6e: 128 MiB VMEM
        return 24 << 20, 64 << 20
    return 10 << 20, 32 << 20                        # v7x (64 MiB/TC) or unknown


def _choose_tiles(NC, Ho, ry, W, itemsize, budget_bytes, fused):
    """Pick (channel-block cblk, output-row tile tho) and the step's VMEM need.

    Accounts for double-buffered input+output blocks, the constant bf16
    selector block, and the in-kernel f32 temporaries (3-way bf16 split +
    accumulator); keeps the grid at >=2 steps for megacore sharding."""
    sel_k = ry * W if fused else W
    sel_bytes = 2 * sel_k * sel_k * 2                # bf16 selector (x2: safety)

    def step_bytes(cblk, tho):
        io = 4 * cblk * tho * ry * W * itemsize      # in + out, double-buffered
        per = cblk * tho * (ry * W if fused else W)  # elements live per matmul
        tmp = 24 * per                               # f32 pieces + accumulators
        return io + sel_bytes + tmp

    tho_cands = [Ho] + [d for d in _divisors_desc(Ho) if d % 8 == 0 and d != Ho]
    nc_divs = _divisors_desc(NC)

    cblk, tho = 1, tho_cands[-1]
    for t in tho_cands:
        fits = [d for d in nc_divs if step_bytes(d, t) <= budget_bytes]
        if fits:
            cblk, tho = fits[0], t
            break

    def n_steps():
        return (NC // cblk) * (Ho // tho)

    # v7x shards the parallel grid axes over 2 TensorCores: never leave one idle.
    if n_steps() < 2:
        smaller_c = [d for d in nc_divs if d < cblk]
        smaller_t = [t for t in tho_cands if t < tho]
        if smaller_c:
            cblk = smaller_c[0]
        elif smaller_t:
            tho = smaller_t[0]
    # Nudge toward >=4 steps while keeping the matmul M dim MXU-friendly.
    if n_steps() < 4:
        smaller_c = [d for d in nc_divs if d < cblk and d * tho >= 256]
        if smaller_c:
            cblk = smaller_c[0]

    return cblk, tho, step_bytes(cblk, tho)


# ---------------------------------------------------------------------------
# Wrapper
# ---------------------------------------------------------------------------
def _xla_pixel_unshuffle(x, ry, rx):
    B, C, H, W = x.shape
    y = x.reshape(B, C, H // ry, ry, W // rx, rx)
    return jnp.transpose(y, (0, 1, 3, 5, 2, 4))


def pixel_unshuffle(x, ry=2, rx=2):
    """Pallas-TPU PixelUnShuffle: (B,C,H,W) -> (B,C,ry,rx,H//ry,W//rx)."""
    B, C, H, W = x.shape
    assert H % ry == 0 and W % rx == 0, "H/W must be divisible by ry/rx"
    Ho, Wo = H // ry, W // rx
    dtype = x.dtype

    if dtype not in (jnp.float32, jnp.bfloat16, jnp.float16):
        # TODO(synk): selector-matmul path is float-only (v7x MXU has no int
        # mode); integer/bool/f64 inputs take the pure data-movement XLA path.
        return _xla_pixel_unshuffle(x, ry, rx)

    direct = (Wo % 128 == 0)          # aligned slices + unmasked Wo-wide stores
    budget, vmem_limit = _vmem_budget()
    itemsize = jnp.dtype(dtype).itemsize
    NC = B * C

    sel_k = W if direct else ry * W
    if 2 * sel_k * sel_k * 2 > budget // 2:
        # Selector would not fit comfortably in VMEM (very wide images):
        # degrade gracefully to XLA instead of risking a VMEM blow-up.
        return _xla_pixel_unshuffle(x, ry, rx)

    cblk, tho, need = _choose_tiles(NC, Ho, ry, W, itemsize, budget,
                                    fused=not direct)
    if need > vmem_limit:
        return _xla_pixel_unshuffle(x, ry, rx)

    # (B,C,H,W) -> (B*C, Ho, ry*W): free, layout-preserving reshape; lane
    # dy*W + w of output-row i holds x[..., i*ry + dy, w].
    xr = x.reshape(NC, Ho, ry * W)

    if direct:
        # csel[w, dx*Wo + j] = 1  iff  w == j*rx + dx   (dx-major lanes)
        src = lax.broadcasted_iota(jnp.int32, (W, rx * Wo), 0)
        dst = lax.broadcasted_iota(jnp.int32, (W, rx * Wo), 1)
        csel = (src == (dst % Wo) * rx + dst // Wo).astype(jnp.bfloat16)

        kernel = functools.partial(_unshuffle_direct_kernel,
                                   ry=ry, rx=rx, cblk=cblk, tho=tho)
        out_shape = jax.ShapeDtypeStruct((NC, ry, rx, Ho, Wo), dtype)
        out_specs = pl.BlockSpec((cblk, ry, rx, tho, Wo),
                                 lambda c, t: (c, 0, 0, t, 0))
        csel_spec = pl.BlockSpec((W, rx * Wo), lambda c, t: (0, 0))
    else:
        # CSEL[dy*W + j*rx + dx, dy*rx*Wo + dx*Wo + j] = 1  (dy,dx in lanes)
        K = ry * W
        src = lax.broadcasted_iota(jnp.int32, (K, K), 0)
        dst = lax.broadcasted_iota(jnp.int32, (K, K), 1)
        dy_ = dst // (rx * Wo)
        dx_ = (dst % (rx * Wo)) // Wo
        j_ = dst % Wo
        csel = (src == dy_ * W + j_ * rx + dx_).astype(jnp.bfloat16)

        kernel = functools.partial(_unshuffle_fused_kernel, cblk=cblk, tho=tho)
        out_shape = jax.ShapeDtypeStruct((NC, Ho, ry * W), dtype)
        out_specs = pl.BlockSpec((cblk, tho, ry * W), lambda c, t: (c, t, 0))
        csel_spec = pl.BlockSpec((K, K), lambda c, t: (0, 0))

    out = pl.pallas_call(
        kernel,
        out_shape=out_shape,
        grid_spec=pltpu.PrefetchScalarGridSpec(
            num_scalar_prefetch=0,
            grid=(NC // cblk, Ho // tho),
            in_specs=[
                csel_spec,                                            # selector
                pl.BlockSpec((cblk, tho, ry * W), lambda c, t: (c, t, 0)),  # x
            ],
            out_specs=out_specs,
        ),
        compiler_params=pltpu.CompilerParams(
            dimension_semantics=("parallel", "parallel"),
            vmem_limit_bytes=vmem_limit,
        ),
    )(csel, xr)

    if direct:
        # Leading-dims-only reshape: free, no extra HBM pass.
        return out.reshape(B, C, ry, rx, Ho, Wo)
    # Wo < 128: kernel output is fully lane-dense; single cheap layout pass.
    out = out.reshape(B, C, Ho, ry, rx, Wo)
    return jnp.transpose(out, (0, 1, 3, 4, 2, 5))


# ---------------------------------------------------------------------------
# Self test
# ---------------------------------------------------------------------------
if __name__ == "__main__":
    root = jax.random.PRNGKey(0)
    k1, k2, k3 = jax.random.split(root, 3)

    # 1) Small shape (Wo < 128 -> fused-lane kernel layout), float32, bit-exact.
    x = jax.random.normal(k1, (2, 4, 16, 16), dtype=jnp.float32)
    out = jax.block_until_ready(pixel_unshuffle(x, 2, 2))
    ref = _xla_pixel_unshuffle(x, 2, 2)
    assert out.shape == ref.shape == (2, 4, 2, 2, 8, 8), (out.shape, ref.shape)
    assert jnp.array_equal(out, ref), "f32 fused-layout path mismatch"

    # 2) Same shape, bfloat16 (single native-bf16 MXU pass), bit-exact.
    xb = x.astype(jnp.bfloat16)
    outb = jax.block_until_ready(pixel_unshuffle(xb, 2, 2))
    refb = _xla_pixel_unshuffle(xb, 2, 2)
    assert jnp.array_equal(outb, refb), "bf16 path mismatch"

    # 3) Wo == 128 -> direct final-layout kernel (no XLA transpose), float32.
    x2 = jax.random.normal(k2, (1, 2, 16, 256), dtype=jnp.float32)
    out2 = jax.block_until_ready(pixel_unshuffle(x2, 2, 2))
    ref2 = _xla_pixel_unshuffle(x2, 2, 2)
    assert out2.shape == ref2.shape == (1, 2, 2, 2, 8, 128)
    assert jnp.array_equal(out2, ref2), "f32 direct-layout path mismatch"

    # 4) Non-square factors (ry=3, rx=2), odd channel count.
    x4 = jax.random.normal(k3, (2, 3, 12, 16), dtype=jnp.float32)
    out4 = jax.block_until_ready(pixel_unshuffle(x4, 3, 2))
    ref4 = _xla_pixel_unshuffle(x4, 3, 2)
    assert out4.shape == ref4.shape == (2, 3, 3, 2, 4, 8)
    assert jnp.array_equal(out4, ref4), "ry=3/rx=2 path mismatch"

    print("KERNEL_OK")
</pallas_src>

<mosaic_0001>
module attributes {stable_mosaic.version = 11 : i64} {
  func.func @_unshuffle_fused_kernel(%arg0: i32, %arg1: i32, %arg2: memref<32x32xbf16, #tpu.memory_space<vmem>>, %arg3: memref<4x8x32xf32, #tpu.memory_space<vmem>>, %arg4: memref<4x8x32xf32, #tpu.memory_space<vmem>>) attributes {dimension_semantics = [#tpu.dimension_semantics<parallel>, #tpu.dimension_semantics<parallel>], iteration_bounds = array<i64: 2, 1>, scalar_prefetch = 0 : i64, scratch_operands = 0 : i64, tpu.core_type = #tpu.core_type<tc>, window_params = [{pipeline_mode = #tpu.pipeline_mode<synchronous>, transform_indices = @transform_0, window_bounds = array<i64: 32, 32>}, {transform_indices = @transform_1, window_bounds = array<i64: 4, 8, 32>}, {transform_indices = @transform_2, window_bounds = array<i64: 4, 8, 32>}]} {
    %c0 = arith.constant 0 : index
    %c0_0 = arith.constant 0 : index
    %c0_1 = arith.constant 0 : index
    %0 = vector.load %arg3[%c0, %c0_0, %c0_1] : memref<4x8x32xf32, #tpu.memory_space<vmem>>, vector<4x8x32xf32>
    %1 = vector.shape_cast %0 : vector<4x8x32xf32> to vector<32x32xf32>
    %c0_2 = arith.constant 0 : index
    %c0_3 = arith.constant 0 : index
    %2 = vector.load %arg2[%c0_2, %c0_3] : memref<32x32xbf16, #tpu.memory_space<vmem>>, vector<32x32xbf16>
    %3 = arith.truncf %1 : vector<32x32xf32> to vector<32x32xbf16>
    %4 = arith.extf %3 : vector<32x32xbf16> to vector<32x32xf32>
    %5 = arith.subf %1, %4 : vector<32x32xf32>
    %6 = arith.truncf %5 : vector<32x32xf32> to vector<32x32xbf16>
    %7 = arith.extf %6 : vector<32x32xbf16> to vector<32x32xf32>
    %8 = arith.subf %5, %7 : vector<32x32xf32>
    %9 = arith.truncf %8 : vector<32x32xf32> to vector<32x32xbf16>
    %cst = arith.constant dense<0.000000e+00> : vector<32x32xf32>
    %10 = tpu.matmul %3, %2, %cst {dimension_numbers = #tpu.dot_dimension_numbers<[1], [0], [0], [1], [0, 0, 1, 1], [], []>} : vector<32x32xbf16>, vector<32x32xbf16>, vector<32x32xf32> -> vector<32x32xf32>
    %cst_4 = arith.constant dense<0.000000e+00> : vector<32x32xf32>
    %11 = tpu.matmul %6, %2, %cst_4 {dimension_numbers = #tpu.dot_dimension_numbers<[1], [0], [0], [1], [0, 0, 1, 1], [], []>} : vector<32x32xbf16>, vector<32x32xbf16>, vector<32x32xf32> -> vector<32x32xf32>
    %12 = arith.addf %10, %11 : vector<32x32xf32>
    %cst_5 = arith.constant dense<0.000000e+00> : vector<32x32xf32>
    %13 = tpu.matmul %9, %2, %cst_5 {dimension_numbers = #tpu.dot_dimension_numbers<[1], [0], [0], [1], [0, 0, 1, 1], [], []>} : vector<32x32xbf16>, vector<32x32xbf16>, vector<32x32xf32> -> vector<32x32xf32>
    %14 = arith.addf %12, %13 : vector<32x32xf32>
    %15 = vector.shape_cast %14 : vector<32x32xf32> to vector<4x8x32xf32>
    %c0_6 = arith.constant 0 : index
    %c0_7 = arith.constant 0 : index
    %c0_8 = arith.constant 0 : index
    %16 = vector.load %arg4[%c0_6, %c0_7, %c0_8] : memref<4x8x32xf32, #tpu.memory_space<vmem>>, vector<4x8x32xf32>
    tpu.vector_store %arg4[%c0_6, %c0_7, %c0_8], %15 {strides = array<i32>} : memref<4x8x32xf32, #tpu.memory_space<vmem>>, vector<4x8x32xf32>,
    return
  }
  func.func @transform_0(%arg0: i32, %arg1: i32) -> (i32, i32) {
    %c0_i32 = arith.constant 0 : i32
    %c0_i32_0 = arith.constant 0 : i32
    %c0_i32_1 = arith.constant 0 : i32
    return %c0_i32, %c0_i32_0 : i32, i32
  }
  func.func @transform_1(%arg0: i32, %arg1: i32) -> (i32, i32, i32) {
    %c0_i32 = arith.constant 0 : i32
    %c0_i32_0 = arith.constant 0 : i32
    return %arg0, %arg1, %c0_i32 : i32, i32, i32
  }
  func.func @transform_2(%arg0: i32, %arg1: i32) -> (i32, i32, i32) {
    %c0_i32 = arith.constant 0 : i32
    %c0_i32_0 = arith.constant 0 : i32
    return %arg0, %arg1, %c0_i32 : i32, i32, i32
  }
}

</mosaic_0001>

<bundles_post_ra>
// kernel: tpu_custom_call.1
= control target key start
LH: loop header
LB: loop body
LE: loop exit
PB: predicated region body
PF: predicated region fallthrough
CT: control target
= control target key end

     0   :  { %7 = vsyncpa [#allocation3], 0  ;;  %s914_s0 = inlined_call_operand.hbm [shape: bf16[32,32], index: 0, kind: input, shape index: {}]   ;;  %s915_s1 = inlined_call_operand.hbm [shape: f32[8,8,32], index: 1, kind: input, shape index: {}]   ;;  %s916_s2 = inlined_call_operand.hbm [shape: f32[8,8,32], index: 2, kind: output, shape index: {}]  }
   0x1   :  { %8 = vsyncpa [#allocation6], 0 }
   0x2   :  { %10 = vsyncpa [#allocation6 + $0x1], 0 }
   0x3   :  { %11 = vsyncpa [#allocation4], 0 }
   0x4   :  { %13 = vsyncpa [#allocation4 + $0x1], 0  ;;  %s751_s9 = smov 0   ;;  %s753_s10 = smov 0  }
   0x5   :  { %s755_s11 = smov 0   ;;  %s757_s12 = smov 0  }
   0x6   :  { %s759_s13 = smov 0   ;;  %s761_s14 = smov 0  }
   0x7 LB: > { %s465_s15 = sadd.s32 4294967295, %s727_s14   ;;  %s466_s16 = sadd.s32 4294967294, %s727_s14   ;;  %s727_s14 = sphi %s761_s14, %s19_s14   ;;  %s723_s13 = sphi %s759_s13, %s928_s13   ;;  %s719_s12 = sphi %s757_s12, %s927_s12   ;;  %s715_s11 = sphi %s755_s11, %s926_s11   ;;  %s711_s10 = sphi %s753_s10, %s925_s10   ;;  %s707_s9 = sphi %s751_s9, %s924_s9  }
   0x8   : > { %p74_p0 = scmp.ne.s32.totalorder %s711_s10, %s707_s9  ;;  %p785_p1 = scmp.eq.s32.totalorder %s465_s15, 0 }
   0x9   : > { %p789_p2 = scmp.eq.s32.totalorder %s465_s15, 1  ;;  %p106_p3 = scmp.eq.s32.totalorder %s466_s16, 1 }
   0xa   : > { %p795_p4 = por %p785_p1, %p74_p0  ;;  %p467_p5 = scmp.ge.s32.totalorder %s727_s14, 1 }
   0xb   : > { %p800_p6 = por %p106_p3, %p74_p0  ;;  %p113_p7 = scmp.lt.s32.totalorder %s727_s14, 3 }
   0xc   : > { %s124_s23 = sshll.u32 %s914_s0, 4  ;;  %s729_s25 = smov [#allocation2]   ;;  %s125_s23 = int_to_ptr.hbm [resolvable:$true] %s124_s23 }
   0xd   : > { %p808_p8 = pnand %p467_p5, %p113_p7  ;;  %s126_s26 = sshll.u32 %s729_s25, 4  ;;  %s127_s26 = int_to_ptr.vmem [resolvable:$true] %s126_s26 }
   0xe   : > { %p469_p11 = scmp.ge.s32.totalorder %s727_s14, 2  ;;  %s730_s27 = smov 64  }
   0xf   : > { %p510_p9 = pneg %p808_p8  ;;  %s731_s28 = smov 4  }
  0x10   : > { %s31_s29 = sadd.s32 1, %s723_s13  ;;  %s61_s30 = sadd.s32 1, %s715_s11 }
  0x11   : > { %p511_p10 = pnand %p510_p9, %p785_p1  ;;  %p33_p12 = scmp.ge.s32.totalorder %s31_s29, 2 }
  0x12   : > { %p68_p13 = scmp.ne.s32.totalorder %s715_s11, %s711_s10  ;;  %p69_p0 = scmp.eq.s32.totalorder %s727_s14, 0 }
  0x13   : > { %513 = dma.hbm_to_vmem [thread:$0]  (!%p511_p10), %s125_s23, 256, %s127_s26, [#allocation3], %s730_s27, %s730_s27, %s731_s28  }
  0x14   : > { %s930_s29 = smov (%p33_p12, %s31_s29), 0  ;;  %p824_p3 = por %p69_p0, %p68_p13 }
  0x15   : > { %p830_p5 = por %p789_p2, %p68_p13  ;;  %s56_s5 = ssub.s32 %s723_s13, %s930_s29 }
  0x16   : > { %p523_p7 = scmp.lt.s32.totalorder %s727_s14, 2  ;;  %p59_p9 = scmp.eq.s32.totalorder %s56_s5, 0 }
  0x17   : > { %s140_s6 = sand.u32 1, %s715_s11   ;;  %s496_s15 = sshll.u32 %s723_s13, 5 }
  0x18   : > { %s470_s7 = sshll.u32 %s140_s6, 5  ;;  %s150_s22 = scalar_lea.hbm %s915_s1, %s496_s15 }
  0x19   : > { %s839_s8 = scalar_select %p59_p9, %s715_s11, %s61_s30  }
  0x1a   : > { %s144_s23 = scalar_lea.vmem [#allocation5], %s470_s7  ;;  %s151_s18 = sshll.u32 %s150_s22, 4  ;;  %s152_s18 = int_to_ptr.hbm [resolvable:$true] %s151_s18 }
  0x1b   : > { %s153_s25 = sshll.u32 %s144_s23, 4  ;;  %p515_p2 = pnand %p523_p7, %p824_p3  ;;  %s154_s25 = int_to_ptr.vmem [resolvable:$true] %s153_s25 }
  0x1c   : > { %s141_s26 = scalar_lea.sflag [#allocation6], %s140_s6  ;;  %s732_s27 = smov 128  }
  0x1d   : > { %s733_s28 = smov 8   ;;  %165 = sbr.rel (%p808_p8) target bundleno = 217 (0xd9), region = 28 }
  0x1e   : > { %517 = dma.hbm_to_vmem [thread:$0]  (!%p515_p2), %s152_s18, 512, %s154_s25, %s141_s26, %s732_s27, %s732_s27, %s733_s28  }
  0x22   : > { %694 = dma.done.wait (%p785_p1), [#allocation3], 256  }
  0x23   : > { %696 = vsyncadd (%p785_p1), [#allocation3], 4294967040  ;;  %s854_s30 = sand.u32 1, %s711_s10  }
  0x24   : > { %s475_s3 = sshll.u32 %s854_s30, 5  ;;  %s173_s5 = scalar_lea.sflag [#allocation6], %s854_s30 }
  0x25   : > { %s176_s6 = scalar_lea.vmem [#allocation5], %s475_s3 }
  0x26   : > { %698 = dma.done.wait (%p795_p4), %s173_s5, 512  }
  0x27   : > { %700 = vsyncadd (%p795_p4), %s173_s5, 4294966784  ;;  %v498_v0 = vld [vmem:[#allocation2 + $0x8] sm:$0xff]  ;;  %v201_v1 = vld [vmem:[%s176_s6] sm:$0xff]  ;;  %vm257_vm0 = vcmask 261120   ;;  %s197_s17 = scalar_lea.vmem [#allocation7], %s475_s3  ;;  %s499_s19 = sshll.u32 %s719_s12, 5 }
  0x28   : > { %v202_v2 = vld [vmem:[%s176_s6 + $0x8] sm:$0xff]  ;;  %v209_v3 = vpack.c.bf16 %v201_v1, %v201_v1  ;;  %v203_v4 = vld [vmem:[%s176_s6 + $0x10] sm:$0xff]  ;;  %v204_v5 = vld [vmem:[%s176_s6 + $0x18] sm:$0xff]  ;;  %305 = vmatpush.bf16.msra.mxu1 %v498_v0  ;;  %270 = vmatpush.bf16.msra.mxu0 %v498_v0  ;;  %s364_s15 = scalar_lea.hbm %s916_s2, %s499_s19  ;;  %s365_s16 = sshll.u32 %s197_s17, 4  ;;  %s366_s16 = int_to_ptr.vmem [resolvable:$true] %s365_s16 }
  0x29   : > { %v497_v6 = vld [vmem:[#allocation2] sm:$0xff]  ;;  %v210_v7 = vpack.c.bf16 %v202_v2, %v202_v2  ;;  %v211_v8 = vpack.c.bf16 %v203_v4, %v203_v4  ;;  %v212_v9 = vpack.c.bf16 %v204_v5, %v204_v5  ;;  %330 = vmatpush.bf16.msra.mxu2 %v498_v0  ;;  %500 = vmatpush.bf16.msra.mxu3 %v498_v0  ;;  %s367_s21 = sshll.u32 %s364_s15, 4  ;;  %s352_s12 = scalar_lea.sflag [#allocation4], %s854_s30  ;;  %s368_s21 = int_to_ptr.hbm [resolvable:$true] %s367_s21 }
  0x2a   : > { %v213_v10 = vunpack.c.l.bf16 %v209_v3  ;;  %v287_v11 = vunpack.c.l.b16 %v209_v3  ;;  %s655_s22 = sshra.s32 %s368_s21, 4  ;;  %s661_s26 = scalar_lea.hbm %s916_s2, 64  ;;  %s656_s22 = int_to_ptr.hbm [resolvable:$true] %s655_s22 }
  0x2b   : > { %v214_v12 = vunpack.c.l.bf16 %v210_v7  ;;  %v288_v13 = vunpack.c.l.b16 %v210_v7  ;;  %v215_v14 = vunpack.c.l.bf16 %v211_v8  ;;  %v216_v15 = vunpack.c.l.bf16 %v212_v9  ;;  %s657_s23 = scalar_lea.hbm %s656_s22, 32  ;;  %p662_p10 = scmp.lt.s32.totalorder %s656_s22, %s916_s2 }
  0x2c   : > { %v217_v16 = vsub.f32 %v201_v1, %v213_v10  ;;  %306 = vmatpush.bf16.msra.mxu1 %v497_v6  ;;  %271 = vmatpush.bf16.msra.mxu0 %v497_v6  ;;  %v289_v36 = vunpack.c.l.b16 %v211_v8  ;;  %v290_v37 = vunpack.c.l.b16 %v212_v9  ;;  %p658_p1 = scmp.ne.s32.totalorder %s656_s22, %s657_s23  ;;  %p663_p12 = scmp.lt.s32.totalorder %s661_s26, %s657_s23 }
  0x2d   : > { %v291_v17 = vpack.c.b16 %v288_v13, %v287_v11  ;;  %v218_v18 = vsub.f32 %v202_v2, %v214_v12  ;;  %v219_v19 = vsub.f32 %v203_v4, %v215_v14  ;;  %331 = vmatpush.bf16.msra.mxu2 %v497_v6  ;;  %501 = vmatpush.bf16.msra.mxu3 %v497_v6 }
  0x2e   : > { %v221_v20 = vpack.c.bf16 %v217_v16, %v217_v16  ;;  %v220_v21 = vsub.f32 %v204_v5, %v216_v15  ;;  %v292_v40 = vpack.c.b16 %v290_v37, %v289_v36  ;;  %p659_p4 = pnand %p658_p1, %p830_p5  ;;  %p664_p13 = por %p663_p12, %p662_p10 }
  0x2f   : > { %v222_v22 = vpack.c.bf16 %v218_v18, %v218_v18  ;;  %v223_v23 = vpack.c.bf16 %v219_v19, %v219_v19  ;;  %487 = vmatmul.msk.bf16.vlgmr.msra.gmra.mxu1 %vm257_vm0, %v291_v17 }
  0x30   : > { %v239_v24 = vunpack.c.l.b16 %v221_v20  ;;  %v225_v25 = vunpack.c.l.bf16 %v221_v20  ;;  %v224_v26 = vpack.c.bf16 %v220_v21, %v220_v21  ;;  %p660_p8 = pneg %p659_p4 }
  0x31   : > { %v240_v27 = vunpack.c.l.b16 %v222_v22  ;;  %v226_v28 = vunpack.c.l.bf16 %v222_v22  ;;  %v241_v29 = vunpack.c.l.b16 %v223_v23  ;;  %v227_v38 = vunpack.c.l.bf16 %v223_v23 }
  0x32   : > { %v229_v30 = vsub.f32 %v217_v16, %v225_v25  ;;  %v242_v31 = vunpack.c.l.b16 %v224_v26  ;;  %v228_v39 = vunpack.c.l.bf16 %v224_v26  ;;  %p665_p0 = pnand %p664_p13, %p660_p8 }
  0x33   : > { %v243_v32 = vpack.c.b16 %v240_v27, %v239_v24  ;;  %v230_v33 = vsub.f32 %v218_v18, %v226_v28  ;;  %v231_v41 = vsub.f32 %v219_v19, %v227_v38 }
  0x34   : > { %v244_v34 = vpack.c.b16 %v242_v31, %v241_v29  ;;  %v232_v42 = vsub.f32 %v220_v21, %v228_v39 }
  0x35   : > { %485 = vmatmul.msk.bf16.vlgmr.msra.gmra.mxu0 %vm257_vm0, %v243_v32  ;;  %v233_v35 = vpack.c.bf16 %v230_v33, %v229_v30 }
  0x36   : > { %486 = vmatmul.msk.bf16.vlgmr.msra.gmra.mxu3 %vm257_vm0, %v244_v34  ;;  %v234_v43 = vpack.c.bf16 %v232_v42, %v231_v41 }
  0x37   : > { %489 = vmatmul.msk.bf16.vlgmr.msra.gmra.mxu2 %vm257_vm0, %v233_v35 }
  0x3f   : > { %488 = vmatmul.msk.bf16.gmra.mxu1 %vm257_vm0, %v292_v40 }
  0x47   : > { %490 = vmatmul.msk.bf16.gmra.mxu2 %vm257_vm0, %v234_v43 }
  0xac   : > { %v308_v44 = vpop.f32.mrf.mxu1 }
  0xb2   : > { %v273_v45 = vpop.f32.mrf.mxu0 }
  0xb3   : > { %v309_v46 = vadd.f32 %v308_v44, %v273_v45 }
  0xb4   : > { %v310_v47 = vpop.f32.mrf.mxu1 }
  0xb9   : > { %v278_v54 = vpop.f32.mrf.mxu3 }
  0xba   : > { %v333_v48 = vpop.f32.mrf.mxu2  ;;  %v275_v50 = vpop.f32.mrf.mxu0 }
  0xbb   : > { %v343_v49 = vadd.f32 %v333_v48, %v309_v46  ;;  %v311_v51 = vadd.f32 %v310_v47, %v275_v50 }
  0xbc   : > { %v313_v55 = vpop.f32.mrf.mxu1 }
  0xbd   : > { %347 = vst.msk [vmem:[%s197_s17] sm:$0xff] %vm257_vm0, %v343_v49  ;;  %v314_v56 = vadd.f32 %v313_v55, %v278_v54 }
  0xc1   : > { %v280_v59 = vpop.f32.mrf.mxu3 }
  0xc2   : > { %v335_v52 = vpop.f32.mrf.mxu2 }
  0xc3   : > { %v344_v53 = vadd.f32 %v335_v52, %v311_v51 }
  0xc4   : > { %v315_v60 = vpop.f32.mrf.mxu1 }
  0xc5   : > { %348 = vst.msk [vmem:[%s197_s17 + $0x8] sm:$0xff] %vm257_vm0, %v344_v53  ;;  %v316_v61 = vadd.f32 %v315_v60, %v280_v59 }
  0xca   : > { %v338_v57 = vpop.f32.mrf.mxu2 }
  0xcb   : > { %v345_v58 = vadd.f32 %v338_v57, %v314_v56 }
  0xcd   : > { %349 = vst.msk [vmem:[%s197_s17 + $0x10] sm:$0xff] %vm257_vm0, %v345_v58 }
  0xd2   : > { %v340_v62 = vpop.f32.mrf.mxu2 }
  0xd3   : > { %v346_v63 = vadd.f32 %v340_v62, %v316_v61 }
  0xd5   : > { %350 = vst.msk [vmem:[%s197_s17 + $0x18] sm:$0xff] %vm257_vm0, %v346_v63 }
  0xd6   : > { %668 = shalt.err (!%p665_p0)
}
  0xd7   : > { %s734_s30 = smov 128   ;;  %s735_s3 = smov 8  }
  0xd8   : > { %508 = dma.vmem_to_hbm [thread:$0]  (%p830_p5), %s366_s16, 512, %s368_s21, %s352_s12, %s734_s30, %s734_s30, %s735_s3  }
  0xd9 PF: > { %s382_s5 = sand.u32 1, %s707_s9   ;;  %p519_p3 = pnand %p469_p11, %p800_p6 }
  0xda   : > { %s383_s6 = scalar_lea.sflag [#allocation4], %s382_s5 }
  0xdb   : > { %p520_p7 = pneg %p519_p3 }
  0xdd   : > { %702 = dma.done.wait (%p520_p7), %s383_s6, 512  }
  0xde   : > { %704 = vsyncadd (%p520_p7), %s383_s6, 4294966784  ;;  %s19_s14 = sadd.s32 1, %s727_s14   ;;  %s924_s9 = smov %s711_s10 }
  0xdf   : > { %p16_p9 = scmp.ge.s32.totalorder %s19_s14, 4   ;;  %s925_s10 = smov %s715_s11 }
  0xe0   : > { %s926_s11 = smov %s839_s8  ;;  %s927_s12 = smov %s723_s13 }
  0xe1   : > { %s928_s13 = smov %s930_s29  ;;  %18 = sbr.rel (!%p16_p9) target bundleno = 7 (0x7), region = 78 }
  0xe6   :  { %389 = vsyncpa [#allocation3], 1 }
  0xe7   :  { %391 = vsyncpa [#allocation3 + $0x1], 1 }
  0xe8   :  { %392 = vsyncpa [#allocation6], 1 }
  0xe9   :  { %394 = vsyncpa [#allocation6 + $0x1], 1 }
  0xea   :  { %395 = vsyncpa [#allocation4], 1 }
  0xeb   :  { %397 = vsyncpa [#allocation4 + $0x1], 1 }

</bundles_post_ra>
